<compile_context>
chip_gen: v7x
topology: tpu7x:2x2x1
jax: 0.10.0
libtpu: 0.0.40
codegen_flags: <defaults>
</compile_context>

<pallas_src>
import math

import jax
import jax.numpy as jnp
from jax.experimental import pallas as pl
from jax.experimental.pallas import tpu as pltpu

LATENTS = 32
ACTIONS = 1
HIDDENS = 256
OUT_FEATURES = 32
K_PAD = 64              # padded contraction dim for the x->gates matmul (real 33)
OUT_PAD = 128           # lane-dense padded fc output width (real 32)
DEFAULT_BLOCK_SEQ = 512 # seq rows per grid step


def _round_up(x, m):
    return (x + m - 1) // m * m


def _sigmoid(x):
    # Single EUP tanh per element; avoids exp + f32 divide (VPU Newton steps).
    return 0.5 * jnp.tanh(0.5 * x) + 0.5


# ----------------------------------------------------------------------------
# Fused kernel: x->gates matmul -> LSTM cell epilogue -> fc head (VMEM-resident).
# ----------------------------------------------------------------------------
def _lstm_fc_kernel(x_ref, hg_ref, c0_ref, wih_ref, wfc_ref, bfc_ref, o_ref):
    hid = c0_ref.shape[-1]
    hg = hg_ref[0]                      # (1, 4H) f32: h0 @ w_hh^T + b_ih + b_hh
    c0 = c0_ref[0]                      # (1, H)  f32
    # Single MXU matmul on the x path (bf16 operands, f32 accumulation).
    gates = jnp.dot(x_ref[...], wih_ref[...],
                    preferred_element_type=jnp.float32) + hg
    # PyTorch LSTMCell gate order: i, f, g, o (aligned 256-wide slices).
    i_g = _sigmoid(gates[:, 0 * hid:1 * hid])
    f_g = _sigmoid(gates[:, 1 * hid:2 * hid])
    g_g = jnp.tanh(gates[:, 2 * hid:3 * hid])
    o_g = _sigmoid(gates[:, 3 * hid:4 * hid])
    c_new = f_g * c0 + i_g * g_g                       # f32 epilogue
    h_new = o_g * jnp.tanh(c_new)
    # fc head fused; output padded to 128 lanes -> unmasked lane-dense stores.
    o_ref[...] = jnp.dot(h_new.astype(wfc_ref.dtype), wfc_ref[...],
                         preferred_element_type=jnp.float32) + bfc_ref[...]


# ----------------------------------------------------------------------------
# Parameters: PyTorch-layout init + one-time prep (transpose/fold/pad/cast).
# ----------------------------------------------------------------------------
def init_params(key, latents=LATENTS, actions=ACTIONS, hiddens=HIDDENS,
                out_features=OUT_FEATURES):
    """Raw parameters in PyTorch layout with LSTMCell/Linear default init."""
    in_dim = latents + actions
    ks = jax.random.split(key, 6)
    bound = 1.0 / math.sqrt(hiddens)
    u = lambda k, shape, b: jax.random.uniform(k, shape, jnp.float32, -b, b)
    return {
        "w_ih": u(ks[0], (4 * hiddens, in_dim), bound),
        "w_hh": u(ks[1], (4 * hiddens, hiddens), bound),
        "b_ih": u(ks[2], (4 * hiddens,), bound),
        "b_hh": u(ks[3], (4 * hiddens,), bound),
        "w_fc": u(ks[4], (out_features, hiddens), bound),
        "b_fc": u(ks[5], (out_features,), bound),
    }


def prepare_params(raw, k_pad=K_PAD, out_pad=OUT_PAD):
    """One-time prep: transpose, fold the two LSTM biases, zero-pad K to 64 and
    the fc output to 128 lanes, and cast matmul weights to bf16 (MXU operands)."""
    in_dim = raw["w_ih"].shape[1]
    out_f = raw["w_fc"].shape[0]
    w_ih_t = jnp.pad(raw["w_ih"].T, ((0, k_pad - in_dim), (0, 0)))
    w_fc_t = jnp.pad(raw["w_fc"].T, ((0, 0), (0, out_pad - out_f)))
    b_fc = jnp.pad(raw["b_fc"], ((0, out_pad - out_f),))
    return {
        "w_ih_t": w_ih_t.astype(jnp.bfloat16),             # (K_PAD, 4H)
        "w_hh_t": raw["w_hh"].T.astype(jnp.bfloat16),       # (H, 4H)
        "b_gates": (raw["b_ih"] + raw["b_hh"]).reshape(1, -1).astype(jnp.float32),
        "w_fc_t": w_fc_t.astype(jnp.bfloat16),              # (H, OUT_PAD)
        "b_fc": b_fc.reshape(1, -1).astype(jnp.float32),    # (1, OUT_PAD)
    }


# ----------------------------------------------------------------------------
# Forward (matches latent_lstm.forward) + pure-JAX reference.
# ----------------------------------------------------------------------------
def latent_lstm_forward(actions, latents, hidden, prepped, *,
                        block_seq=DEFAULT_BLOCK_SEQ):
    """actions: (seq, bs, A); latents: (seq, bs, L); hidden = (h0, c0), each
    (bs, H) (shared across seq, as in the reference's single LSTMCell call)."""
    h0, c0 = hidden
    seq, bs = actions.shape[0], actions.shape[1]
    in_dim = actions.shape[-1] + latents.shape[-1]
    K = prepped["w_ih_t"].shape[0]
    H = prepped["w_hh_t"].shape[0]
    OP = prepped["w_fc_t"].shape[1]

    # Hoisted h-path: tiny (bs, 4H) matmul + folded bias, computed once in f32.
    h_gates = (jnp.dot(h0.astype(jnp.bfloat16), prepped["w_hh_t"],
                       preferred_element_type=jnp.float32)
               + prepped["b_gates"]).reshape(bs, 1, 4 * H)
    c0f = c0.astype(jnp.float32).reshape(bs, 1, H)

    # (seq, bs, .) -> (bs, seq, .); build [actions | latents | 0-pad] in bf16.
    a_b = jnp.swapaxes(actions, 0, 1).astype(jnp.bfloat16)
    l_b = jnp.swapaxes(latents, 0, 1).astype(jnp.bfloat16)
    zpad = jnp.zeros((bs, seq, K - in_dim), jnp.bfloat16)
    x = jnp.concatenate([a_b, l_b, zpad], axis=-1)

    # Seq tile: multiple of 16 (bf16 sublane pack); keep >= 2 total grid steps
    # whenever possible so both v7x TensorCores engage.
    bm = min(block_seq, _round_up(seq, 16))
    if bs == 1 and seq > 16:
        bm = min(bm, _round_up((seq + 1) // 2, 16))
    Sp = _round_up(seq, bm)
    if Sp != seq:
        x = jnp.pad(x, ((0, 0), (0, Sp - seq), (0, 0)))
    x = x.reshape(bs * Sp, K)
    n_s = Sp // bm

    out = pl.pallas_call(
        _lstm_fc_kernel,
        out_shape=jax.ShapeDtypeStruct((bs * Sp, OP), jnp.float32),
        grid=(bs, n_s),
        in_specs=[
            pl.BlockSpec((bm, K), lambda b, s: (b * n_s + s, 0)),   # x (bf16)
            pl.BlockSpec((1, 1, 4 * H), lambda b, s: (b, 0, 0)),    # h_gates (f32)
            pl.BlockSpec((1, 1, H), lambda b, s: (b, 0, 0)),        # c0 (f32)
            pl.BlockSpec((K, 4 * H), lambda b, s: (0, 0)),          # w_ih_t (bf16)
            pl.BlockSpec((H, OP), lambda b, s: (0, 0)),             # w_fc_t (bf16)
            pl.BlockSpec((1, OP), lambda b, s: (0, 0)),             # b_fc (f32)
        ],
        out_specs=pl.BlockSpec((bm, OP), lambda b, s: (b * n_s + s, 0)),
        compiler_params=pltpu.CompilerParams(
            dimension_semantics=("parallel", "parallel"),
            vmem_limit_bytes=32 * 1024 * 1024,
        ),
    )(x, h_gates, c0f, prepped["w_ih_t"], prepped["w_fc_t"], prepped["b_fc"])

    out = out.reshape(bs, Sp, OP)[:, :seq, :OUT_FEATURES]
    return jnp.swapaxes(out, 0, 1)                        # (seq, bs, 32)


def latent_lstm_reference(actions, latents, hidden, raw):
    """Pure-JAX reference with matching bf16 matmul operand precision."""
    h0, c0 = hidden
    H = raw["w_hh"].shape[1]
    bf = lambda a: a.astype(jnp.bfloat16)
    ins = jnp.concatenate([actions, latents], axis=-1)
    gates = (
        jnp.dot(bf(ins), bf(raw["w_ih"]).T, preferred_element_type=jnp.float32)
        + jnp.dot(bf(h0), bf(raw["w_hh"]).T, preferred_element_type=jnp.float32)
        + raw["b_ih"] + raw["b_hh"]
    )
    i_g = jax.nn.sigmoid(gates[..., 0 * H:1 * H])
    f_g = jax.nn.sigmoid(gates[..., 1 * H:2 * H])
    g_g = jnp.tanh(gates[..., 2 * H:3 * H])
    o_g = jax.nn.sigmoid(gates[..., 3 * H:4 * H])
    c_new = f_g * c0 + i_g * g_g
    h_new = o_g * jnp.tanh(c_new)
    return (jnp.dot(bf(h_new), bf(raw["w_fc"]).T,
                    preferred_element_type=jnp.float32) + raw["b_fc"])


if __name__ == "__main__":
    SEQ, BS = 8, 2
    key = jax.random.PRNGKey(0)
    k_a, k_l, k_h, k_c, k_p = jax.random.split(key, 5)

    actions = jax.random.normal(k_a, (SEQ, BS, ACTIONS), jnp.float32)
    latents = jax.random.normal(k_l, (SEQ, BS, LATENTS), jnp.float32)
    h0 = jax.random.normal(k_h, (BS, HIDDENS), jnp.float32)
    c0 = jax.random.normal(k_c, (BS, HIDDENS), jnp.float32)

    raw = init_params(k_p)
    prepped = prepare_params(raw)

    fwd = jax.jit(latent_lstm_forward)
    out = fwd(actions, latents, (h0, c0), prepped)
    out = jax.block_until_ready(out)
    assert out.shape == (SEQ, BS, OUT_FEATURES), out.shape

    ref = latent_lstm_reference(actions, latents, (h0, c0), raw)
    err = float(jnp.max(jnp.abs(out - ref)))
    assert err < 2e-3, f"max abs err vs reference: {err}"
    print("KERNEL_OK")
</pallas_src>

<mosaic_0001>
module attributes {stable_mosaic.version = 11 : i64} {
  func.func @_lstm_fc_kernel(%arg0: i32, %arg1: i32, %arg2: memref<16x64xbf16, #tpu.memory_space<vmem>>, %arg3: memref<1x1x1024xf32, #tpu.memory_space<vmem>>, %arg4: memref<1x1x256xf32, #tpu.memory_space<vmem>>, %arg5: memref<64x1024xbf16, #tpu.memory_space<vmem>>, %arg6: memref<256x128xbf16, #tpu.memory_space<vmem>>, %arg7: memref<1x128xf32, #tpu.memory_space<vmem>>, %arg8: memref<16x128xf32, #tpu.memory_space<vmem>>) attributes {dimension_semantics = [#tpu.dimension_semantics<parallel>, #tpu.dimension_semantics<parallel>], iteration_bounds = array<i64: 2, 1>, scalar_prefetch = 0 : i64, scratch_operands = 0 : i64, tpu.core_type = #tpu.core_type<tc>, window_params = [{transform_indices = @transform_0, window_bounds = array<i64: 16, 64>}, {transform_indices = @transform_1, window_bounds = array<i64: 1, 1, 1024>}, {transform_indices = @transform_2, window_bounds = array<i64: 1, 1, 256>}, {pipeline_mode = #tpu.pipeline_mode<synchronous>, transform_indices = @transform_3, window_bounds = array<i64: 64, 1024>}, {pipeline_mode = #tpu.pipeline_mode<synchronous>, transform_indices = @transform_4, window_bounds = array<i64: 256, 128>}, {pipeline_mode = #tpu.pipeline_mode<synchronous>, transform_indices = @transform_5, window_bounds = array<i64: 1, 128>}, {transform_indices = @transform_6, window_bounds = array<i64: 16, 128>}]} {
    %c0 = arith.constant 0 : index
    %c0_0 = arith.constant 0 : index
    %c0_1 = arith.constant 0 : index
    %0 = vector.load %arg3[%c0, %c0_0, %c0_1] : memref<1x1x1024xf32, #tpu.memory_space<vmem>>, vector<1x1x1024xf32>
    %1 = vector.shape_cast %0 : vector<1x1x1024xf32> to vector<1x1024xf32>
    %c0_2 = arith.constant 0 : index
    %c0_3 = arith.constant 0 : index
    %c0_4 = arith.constant 0 : index
    %2 = vector.load %arg4[%c0_2, %c0_3, %c0_4] : memref<1x1x256xf32, #tpu.memory_space<vmem>>, vector<1x1x256xf32>
    %3 = vector.shape_cast %2 : vector<1x1x256xf32> to vector<1x256xf32>
    %c0_5 = arith.constant 0 : index
    %c0_6 = arith.constant 0 : index
    %4 = vector.load %arg2[%c0_5, %c0_6] : memref<16x64xbf16, #tpu.memory_space<vmem>>, vector<16x64xbf16>
    %c0_7 = arith.constant 0 : index
    %c0_8 = arith.constant 0 : index
    %5 = vector.load %arg5[%c0_7, %c0_8] : memref<64x1024xbf16, #tpu.memory_space<vmem>>, vector<64x1024xbf16>
    %cst = arith.constant dense<0.000000e+00> : vector<16x1024xf32>
    %6 = tpu.matmul %4, %5, %cst {dimension_numbers = #tpu.dot_dimension_numbers<[1], [0], [0], [1], [0, 0, 1, 1], [], []>} : vector<16x64xbf16>, vector<64x1024xbf16>, vector<16x1024xf32> -> vector<16x1024xf32>
    %7 = vector.broadcast %1 : vector<1x1024xf32> to vector<16x1024xf32>
    %8 = arith.addf %6, %7 : vector<16x1024xf32>
    %9 = vector.extract_strided_slice %8 {offsets = [0, 0], sizes = [16, 256], strides = [1, 1]} : vector<16x1024xf32> to vector<16x256xf32>
    %cst_9 = arith.constant 5.000000e-01 : f32
    %10 = vector.broadcast %cst_9 : f32 to vector<16x256xf32>
    %11 = arith.mulf %10, %9 : vector<16x256xf32>
    %12 = math.tanh %11 : vector<16x256xf32>
    %cst_10 = arith.constant 5.000000e-01 : f32
    %13 = vector.broadcast %cst_10 : f32 to vector<16x256xf32>
    %14 = arith.mulf %13, %12 : vector<16x256xf32>
    %cst_11 = arith.constant 5.000000e-01 : f32
    %15 = vector.broadcast %cst_11 : f32 to vector<16x256xf32>
    %16 = arith.addf %14, %15 : vector<16x256xf32>
    %17 = vector.extract_strided_slice %8 {offsets = [0, 256], sizes = [16, 256], strides = [1, 1]} : vector<16x1024xf32> to vector<16x256xf32>
    %cst_12 = arith.constant 5.000000e-01 : f32
    %18 = vector.broadcast %cst_12 : f32 to vector<16x256xf32>
    %19 = arith.mulf %18, %17 : vector<16x256xf32>
    %20 = math.tanh %19 : vector<16x256xf32>
    %cst_13 = arith.constant 5.000000e-01 : f32
    %21 = vector.broadcast %cst_13 : f32 to vector<16x256xf32>
    %22 = arith.mulf %21, %20 : vector<16x256xf32>
    %cst_14 = arith.constant 5.000000e-01 : f32
    %23 = vector.broadcast %cst_14 : f32 to vector<16x256xf32>
    %24 = arith.addf %22, %23 : vector<16x256xf32>
    %25 = vector.extract_strided_slice %8 {offsets = [0, 512], sizes = [16, 256], strides = [1, 1]} : vector<16x1024xf32> to vector<16x256xf32>
    %26 = math.tanh %25 : vector<16x256xf32>
    %27 = vector.extract_strided_slice %8 {offsets = [0, 768], sizes = [16, 256], strides = [1, 1]} : vector<16x1024xf32> to vector<16x256xf32>
    %cst_15 = arith.constant 5.000000e-01 : f32
    %28 = vector.broadcast %cst_15 : f32 to vector<16x256xf32>
    %29 = arith.mulf %28, %27 : vector<16x256xf32>
    %30 = math.tanh %29 : vector<16x256xf32>
    %cst_16 = arith.constant 5.000000e-01 : f32
    %31 = vector.broadcast %cst_16 : f32 to vector<16x256xf32>
    %32 = arith.mulf %31, %30 : vector<16x256xf32>
    %cst_17 = arith.constant 5.000000e-01 : f32
    %33 = vector.broadcast %cst_17 : f32 to vector<16x256xf32>
    %34 = arith.addf %32, %33 : vector<16x256xf32>
    %35 = vector.broadcast %3 : vector<1x256xf32> to vector<16x256xf32>
    %36 = arith.mulf %24, %35 : vector<16x256xf32>
    %37 = arith.mulf %16, %26 : vector<16x256xf32>
    %38 = arith.addf %36, %37 : vector<16x256xf32>
    %39 = math.tanh %38 : vector<16x256xf32>
    %40 = arith.mulf %34, %39 : vector<16x256xf32>
    %41 = arith.truncf %40 : vector<16x256xf32> to vector<16x256xbf16>
    %c0_18 = arith.constant 0 : index
    %c0_19 = arith.constant 0 : index
    %42 = vector.load %arg6[%c0_18, %c0_19] : memref<256x128xbf16, #tpu.memory_space<vmem>>, vector<256x128xbf16>
    %cst_20 = arith.constant dense<0.000000e+00> : vector<16x128xf32>
    %43 = tpu.matmul %41, %42, %cst_20 {dimension_numbers = #tpu.dot_dimension_numbers<[1], [0], [0], [1], [0, 0, 1, 1], [], []>} : vector<16x256xbf16>, vector<256x128xbf16>, vector<16x128xf32> -> vector<16x128xf32>
    %c0_21 = arith.constant 0 : index
    %c0_22 = arith.constant 0 : index
    %44 = vector.load %arg7[%c0_21, %c0_22] : memref<1x128xf32, #tpu.memory_space<vmem>>, vector<1x128xf32>
    %45 = vector.broadcast %44 : vector<1x128xf32> to vector<16x128xf32>
    %46 = arith.addf %43, %45 : vector<16x128xf32>
    %c0_23 = arith.constant 0 : index
    %c0_24 = arith.constant 0 : index
    %47 = vector.load %arg8[%c0_23, %c0_24] : memref<16x128xf32, #tpu.memory_space<vmem>>, vector<16x128xf32>
    tpu.vector_store %arg8[%c0_23, %c0_24], %46 {strides = array<i32>} : memref<16x128xf32, #tpu.memory_space<vmem>>, vector<16x128xf32>,
    return
  }
  func.func @transform_0(%arg0: i32, %arg1: i32) -> (i32, i32) {
    %c1_i32 = arith.constant 1 : i32
    %0 = arith.muli %arg0, %c1_i32 : i32
    %1 = arith.addi %0, %arg1 : i32
    %c0_i32 = arith.constant 0 : i32
    %c0_i32_0 = arith.constant 0 : i32
    return %1, %c0_i32 : i32, i32
  }
  func.func @transform_1(%arg0: i32, %arg1: i32) -> (i32, i32, i32) {
    %c0_i32 = arith.constant 0 : i32
    %c0_i32_0 = arith.constant 0 : i32
    %c0_i32_1 = arith.constant 0 : i32
    return %arg0, %c0_i32, %c0_i32_0 : i32, i32, i32
  }
  func.func @transform_2(%arg0: i32, %arg1: i32) -> (i32, i32, i32) {
    %c0_i32 = arith.constant 0 : i32
    %c0_i32_0 = arith.constant 0 : i32
    %c0_i32_1 = arith.constant 0 : i32
    return %arg0, %c0_i32, %c0_i32_0 : i32, i32, i32
  }
  func.func @transform_3(%arg0: i32, %arg1: i32) -> (i32, i32) {
    %c0_i32 = arith.constant 0 : i32
    %c0_i32_0 = arith.constant 0 : i32
    %c0_i32_1 = arith.constant 0 : i32
    return %c0_i32, %c0_i32_0 : i32, i32
  }
  func.func @transform_4(%arg0: i32, %arg1: i32) -> (i32, i32) {
    %c0_i32 = arith.constant 0 : i32
    %c0_i32_0 = arith.constant 0 : i32
    %c0_i32_1 = arith.constant 0 : i32
    return %c0_i32, %c0_i32_0 : i32, i32
  }
  func.func @transform_5(%arg0: i32, %arg1: i32) -> (i32, i32) {
    %c0_i32 = arith.constant 0 : i32
    %c0_i32_0 = arith.constant 0 : i32
    %c0_i32_1 = arith.constant 0 : i32
    return %c0_i32, %c0_i32_0 : i32, i32
  }
  func.func @transform_6(%arg0: i32, %arg1: i32) -> (i32, i32) {
    %c1_i32 = arith.constant 1 : i32
    %0 = arith.muli %arg0, %c1_i32 : i32
    %1 = arith.addi %0, %arg1 : i32
    %c0_i32 = arith.constant 0 : i32
    %c0_i32_0 = arith.constant 0 : i32
    return %1, %c0_i32 : i32, i32
  }
}

</mosaic_0001>

<bundles_post_ra>
// kernel: latent_lstm_forward.1
= control target key start
LH: loop header
LB: loop body
LE: loop exit
PB: predicated region body
PF: predicated region fallthrough
CT: control target
= control target key end

     0   :  { %s1318_s21 = smov 0   ;;  %s1320_s22 = smov 0   ;;  %s1553_s0 = inlined_call_operand.vmem [shape: bf16[32,64], index: 0, kind: input, shape index: {}]   ;;  %s1554_s1 = inlined_call_operand.vmem [shape: f32[2,1,1024], index: 1, kind: input, shape index: {}]   ;;  %s1555_s2 = inlined_call_operand.vmem [shape: f32[2,1,256], index: 2, kind: input, shape index: {}]   ;;  %s1556_s3 = inlined_call_operand.vmem [shape: bf16[64,1024], index: 3, kind: input, shape index: {}]   ;;  %s1557_s4 = inlined_call_operand.vmem [shape: bf16[256,128], index: 4, kind: input, shape index: {}]   ;;  %s1558_s5 = inlined_call_operand.vmem [shape: f32[1,128], index: 5, kind: input, shape index: {}]   ;;  %s1559_s6 = inlined_call_operand.vmem [shape: f32[32,128], index: 6, kind: output, shape index: {}]  }
   0x1   :  { %s1322_s23 = smov 0  }
   0x2 LB: > { %s28_s24 = sadd.s32 1, %s1276_s22  ;;  %p1091_p0 = scmp.ge.s32.totalorder %s1280_s23, 1  ;;  %s1280_s23 = sphi %s1322_s23, %s16_s23   ;;  %s1276_s22 = sphi %s1320_s22, %s1561_s22   ;;  %s1272_s21 = sphi %s1318_s21, %s1560_s21  }
   0x3   : > { %p30_p1 = scmp.ge.s32.totalorder %s28_s24, 2  ;;  %p249_p2 = scmp.lt.s32.totalorder %s1280_s23, 3 }
   0x5   : > { %s1563_s24 = smov (%p30_p1, %s28_s24), 0  ;;  %p250_p3 = pnand %p1091_p0, %p249_p2 }
   0x6   : > { %v318_v0 = vld [vmem:[%s1556_s3] sm:$0xff] (!%p250_p3)  ;;  %s1092_s7 = sshll.u32 (!%p250_p3), %s1272_s21, 1  ;;  %v320_v6 = vld [vmem:[%s1556_s3 + $0x10] sm:$0xff] (!%p250_p3)  ;;  %v1282_v8 = vmov (!%p250_p3), 0   ;;  %v319_v30 = vld [vmem:[%s1556_s3 + $0x8] sm:$0xff] (!%p250_p3)  ;;  %vm556_vm0 = vcmask (!%p250_p3), 523264  }
   0x7   : > { %253 = sbr.rel (%p250_p3) target bundleno = 520 (0x208), region = 44  ;;  %v322_v1 = vld [vmem:[%s1556_s3 + $0x20] sm:$0xff] (!%p250_p3)  ;;  %v324_v7 = vld [vmem:[%s1556_s3 + $0x30] sm:$0xff] (!%p250_p3)  ;;  %592 = vmatprep.mubr.bf16.mxu1 (!%p250_p3), %v1282_v8  ;;  %p291_p4 = scmp.lt.s32.totalorder (!%p250_p3), %s1092_s7, 3  ;;  %678 = vmatprep.mubr.bf16.mxu0 (!%p250_p3), %v1282_v8  ;;  %v323_v31 = vld [vmem:[%s1556_s3 + $0x28] sm:$0xff] (!%p250_p3) }
   0x8   : > { %v326_v2 = vld [vmem:[%s1556_s3 + $0x40] sm:$0xff] (!%p250_p3)  ;;  %v1100_v3 = vcombine.high (!%p250_p3), %v318_v0, %v322_v1  ;;  %v1099_v4 = vcombine.low (!%p250_p3), %v318_v0, %v322_v1  ;;  %v1104_v10 = vcombine.high (!%p250_p3), %v320_v6, %v324_v7  ;;  %v1103_v11 = vcombine.low (!%p250_p3), %v320_v6, %v324_v7  ;;  %v328_v14 = vld [vmem:[%s1556_s3 + $0x50] sm:$0xff] (!%p250_p3)  ;;  %v327_v34 = vld [vmem:[%s1556_s3 + $0x48] sm:$0xff] (!%p250_p3)  ;;  %p297_p5 = scmp.lt.s32.totalorder (!%p250_p3), %s1272_s21, 1 }
   0x9   : > { %v330_v5 = vld [vmem:[%s1556_s3 + $0x60] sm:$0xff] (!%p250_p3)  ;;  %v332_v15 = vld [vmem:[%s1556_s3 + $0x70] sm:$0xff] (!%p250_p3)  ;;  %v331_v35 = vld [vmem:[%s1556_s3 + $0x68] sm:$0xff] (!%p250_p3)  ;;  %v1102_v37 = vcombine.high (!%p250_p3), %v319_v30, %v323_v31  ;;  %v1101_v39 = vcombine.low (!%p250_p3), %v319_v30, %v323_v31 }
   0xa   : > { %v1108_v9 = vcombine.high (!%p250_p3), %v326_v2, %v330_v5  ;;  %v334_v12 = vld [vmem:[%s1556_s3 + $0x80] sm:$0xff] (!%p250_p3)  ;;  %560 = vmatprep.subr.bf16.mxu1 (!%p250_p3), %v1100_v3  ;;  %v1107_v16 = vcombine.low (!%p250_p3), %v326_v2, %v330_v5  ;;  %646 = vmatprep.subr.bf16.mxu0 (!%p250_p3), %v1104_v10  ;;  %v1112_v17 = vcombine.high (!%p250_p3), %v328_v14, %v332_v15  ;;  %v336_v18 = vld [vmem:[%s1556_s3 + $0x90] sm:$0xff] (!%p250_p3)  ;;  %v335_v40 = vld [vmem:[%s1556_s3 + $0x88] sm:$0xff] (!%p250_p3) }
   0xb   : > { %v338_v13 = vld [vmem:[%s1556_s3 + $0xa0] sm:$0xff] (!%p250_p3)  ;;  %561 = vmatpush1.bf16.msra.mxu1 (!%p250_p3), %v1099_v4  ;;  %v340_v19 = vld [vmem:[%s1556_s3 + $0xb0] sm:$0xff] (!%p250_p3)  ;;  %647 = vmatpush1.bf16.msra.mxu0 (!%p250_p3), %v1103_v11  ;;  %v1111_v21 = vcombine.low (!%p250_p3), %v328_v14, %v332_v15  ;;  %v339_v41 = vld [vmem:[%s1556_s3 + $0xa8] sm:$0xff] (!%p250_p3)  ;;  %v1110_v42 = vcombine.high (!%p250_p3), %v327_v34, %v331_v35  ;;  %v1109_v43 = vcombine.low (!%p250_p3), %v327_v34, %v331_v35 }
   0xc   : > { %562 = vmatprep.subr.bf16.mxu1 (!%p250_p3), %v1108_v9  ;;  %v1116_v20 = vcombine.high (!%p250_p3), %v334_v12, %v338_v13  ;;  %648 = vmatprep.subr.bf16.mxu0 (!%p250_p3), %v1112_v17  ;;  %v342_v22 = vld [vmem:[%s1556_s3 + $0xc0] sm:$0xff] (!%p250_p3)  ;;  %v1120_v24 = vcombine.high (!%p250_p3), %v336_v18, %v340_v19  ;;  %v344_v25 = vld [vmem:[%s1556_s3 + $0xd0] sm:$0xff] (!%p250_p3)  ;;  %v1115_v27 = vcombine.low (!%p250_p3), %v334_v12, %v338_v13  ;;  %v343_v44 = vld [vmem:[%s1556_s3 + $0xc8] sm:$0xff] (!%p250_p3) }
   0xd   : > { %v346_v23 = vld [vmem:[%s1556_s3 + $0xe0] sm:$0xff] (!%p250_p3)  ;;  %v348_v26 = vld [vmem:[%s1556_s3 + $0xf0] sm:$0xff] (!%p250_p3)  ;;  %v1119_v29 = vcombine.low (!%p250_p3), %v336_v18, %v340_v19  ;;  %v347_v45 = vld [vmem:[%s1556_s3 + $0xe8] sm:$0xff] (!%p250_p3)  ;;  %v1118_v46 = vcombine.high (!%p250_p3), %v335_v40, %v339_v41  ;;  %v1117_v47 = vcombine.low (!%p250_p3), %v335_v40, %v339_v41  ;;  %v351_v18 = vlaneseq (!%p250_p3) }
   0xe   : > { %s1565_s7 = smov (!%p291_p4, %s1092_s7), 3  ;;  %v1124_v28 = vcombine.high %v342_v22, %v346_v23  ;;  %v1128_v32 = vcombine.high %v344_v25, %v348_v26  ;;  %v1123_v33 = vcombine.low %v342_v22, %v346_v23  ;;  %v1127_v38 = vcombine.low %v344_v25, %v348_v26  ;;  %v321_v49 = vld [vmem:[%s1556_s3 + $0x18] sm:$0xff]  ;;  %v1202_v2 = vld [vmem:[%s1557_s4 + $0x40] sm:$0xff]   ;;  %v1204_v4 = vld [vmem:[%s1557_s4 + $0x48] sm:$0xff]   ;;  %s1567_s21 = smov (!%p297_p5, %s1272_s21), 1 }
   0xf   : > { %s1093_s30 = sshll.u32 %s1565_s7, 2  ;;  %563 = vmatpush1.bf16.msra.mxu1 %v1107_v16  ;;  %649 = vmatpush1.bf16.msra.mxu0 %v1111_v21  ;;  %v1126_v48 = vcombine.high %v343_v44, %v347_v45  ;;  %v325_v50 = vld [vmem:[%s1556_s3 + $0x38] sm:$0xff]  ;;  %v1125_v51 = vcombine.low %v343_v44, %v347_v45  ;;  %v1203_v3 = vld [vmem:[%s1557_s4] sm:$0xff]   ;;  %v1205_v5 = vld [vmem:[%s1557_s4 + $0x8] sm:$0xff]   ;;  %v1502_v19 = vshrl.u32 %v351_v18, 7  ;;  %s1095_s11 = sshll.u32 %s1567_s21, 1 }
  0x10   : > { %s294_s14 = scalar_lea.vmem %s1553_s0, %s1093_s30  ;;  %564 = vmatprep.subr.bf16.mxu1 %v1116_v20  ;;  %650 = vmatprep.subr.bf16.mxu0 %v1120_v24  ;;  %v1106_v52 = vcombine.high %v321_v49, %v325_v50  ;;  %v329_v53 = vld [vmem:[%s1556_s3 + $0x58] sm:$0xff]  ;;  %v1105_v55 = vcombine.low %v321_v49, %v325_v50  ;;  %v1206_v6 = vld [vmem:[%s1557_s4 + $0x50] sm:$0xff]   ;;  %v1210_v10 = vld [vmem:[%s1557_s4 + $0x60] sm:$0xff]   ;;  %s1094_s30 = sshll.u32 %s1567_s21, 3 }
  0x11   : > { %v1201_v36 = vld [vmem:[%s294_s14] sm:$0xff]   ;;  %v333_v54 = vld [vmem:[%s1556_s3 + $0x78] sm:$0xff]  ;;  %v1207_v7 = vld [vmem:[%s1557_s4 + $0x10] sm:$0xff]   ;;  %s300_s10 = scalar_lea.vmem %s1554_s1, %s1094_s30  ;;  %v353_v20 = vsub.s32 0, %v1502_v19  ;;  %v357_v22 = vsub.s32 1, %v1502_v19  ;;  %v369_v23 = vsub.s32 4, %v1502_v19  ;;  %s304_s14 = scalar_lea.vmem %s1555_s2, %s1095_s11 }
  0x12   : > { %v1114_v56 = vcombine.high %v329_v53, %v333_v54  ;;  %v337_v57 = vld [vmem:[%s1556_s3 + $0x98] sm:$0xff]  ;;  %v1113_v59 = vcombine.low %v329_v53, %v333_v54  ;;  %v1211_v11 = vld [vmem:[%s1557_s4 + $0x20] sm:$0xff]   ;;  %v1212_v12 = vld [vmem:[%s1557_s4 + $0x68] sm:$0xff]   ;;  %v373_v25 = vsub.s32 5, %v1502_v19  ;;  %v361_v49 = vsub.s32 2, %v1502_v19  ;;  %s1097_s21 = sshll.u32 %s1565_s7, 3 }
  0x13   : > { %565 = vmatpush1.bf16.msra.mxu1 %v1115_v27  ;;  %651 = vmatpush1.bf16.msra.mxu0 %v1119_v29  ;;  %v341_v58 = vld [vmem:[%s1556_s3 + $0xb8] sm:$0xff]  ;;  %v1213_v13 = vld [vmem:[%s1557_s4 + $0x28] sm:$0xff]   ;;  %v1214_v14 = vld [vmem:[%s1557_s4 + $0x70] sm:$0xff]   ;;  %v365_v50 = vsub.s32 3, %v1502_v19  ;;  %s310_s19 = scalar_lea.vmem %s1559_s6, %s1097_s21 }
  0x14   : > { %566 = vmatprep.subr.bf16.mxu1 %v1124_v28  ;;  %652 = vmatprep.subr.bf16.mxu0 %v1128_v32  ;;  %v1122_v60 = vcombine.high %v337_v57, %v341_v58  ;;  %v345_v61 = vld [vmem:[%s1556_s3 + $0xd8] sm:$0xff]  ;;  %v1121_v63 = vcombine.low %v337_v57, %v341_v58  ;;  %v1215_v15 = vld [vmem:[%s1557_s4 + $0x30] sm:$0xff]   ;;  %v1508_v21 = vld [vmem:[%s300_s10] sm:$0xff] }
  0x15   : > { %v349_v62 = vld [vmem:[%s1556_s3 + $0xf8] sm:$0xff]  ;;  %v354_v24 = vrot.slane %v1508_v21, %v353_v20  ;;  %v358_v26 = vrot.slane %v1508_v21, %v357_v22  ;;  %v370_v27 = vrot.slane %v1508_v21, %v369_v23  ;;  %v374_v32 = vrot.slane %v1508_v21, %v373_v25 }
  0x16   : > { %v1130_v0 = vcombine.high %v345_v61, %v349_v62  ;;  %v1129_v1 = vcombine.low %v345_v61, %v349_v62  ;;  %v1209_v9 = vld [vmem:[%s1557_s4 + $0x18] sm:$0xff]   ;;  %v366_v53 = vrot.slane %v1508_v21, %v365_v50  ;;  %v377_v25 = vsub.s32 6, %v1502_v19 }
  0x17   : > { %567 = vmatpush1.bf16.msra.mxu1 %v1123_v33  ;;  %653 = vmatpush1.bf16.msra.mxu0 %v1127_v38  ;;  %v1216_v16 = vld [vmem:[%s1557_s4 + $0x78] sm:$0xff]  }
  0x18   : > { %603 = vmatprep.subr.bf16.mxu1 %v1102_v37  ;;  %1154 = vmatprep.subr.bf16.mxu0 %v1202_v2  ;;  %v1217_v17 = vld [vmem:[%s1557_s4 + $0x38] sm:$0xff]  }
  0x1a   : > { %1131 = vmatmul.mubr.msk.bf16.vlgmr.msra.gmra.mrb[0].mxu1 %vm556_vm0, %v1201_v36  ;;  %1133 = vmatmul.mubr.msk.bf16.vlgmr.msra.gmra.mrb[0].mxu0 %vm556_vm0, %v1201_v36 }
  0x1b   : > { %604 = vmatpush1.bf16.msra.mxu1 %v1101_v39  ;;  %635 = vmatprep.mubr.bf16.mxu1 %v1282_v8 }
  0x1c   : > { %605 = vmatprep.subr.bf16.mxu1 %v1110_v42  ;;  %1155 = vmatpush3.bf16.msra.mxu0 %v1203_v3 }
  0x1d   : > { %1156 = vmatprep.subr.bf16.mxu0 %v1204_v4 }
  0x1f   : > { %606 = vmatpush1.bf16.msra.mxu1 %v1109_v43 }
  0x20   : > { %607 = vmatprep.subr.bf16.mxu1 %v1118_v46  ;;  %1157 = vmatpush3.bf16.msra.mxu0 %v1205_v5 }
  0x21   : > { %1158 = vmatprep.subr.bf16.mxu0 %v1206_v6 }
  0x23   : > { %608 = vmatpush1.bf16.msra.mxu1 %v1117_v47 }
  0x24   : > { %609 = vmatprep.subr.bf16.mxu1 %v1126_v48  ;;  %1159 = vmatpush3.bf16.msra.mxu0 %v1207_v7 }
  0x27   : > { %610 = vmatpush1.bf16.msra.mxu1 %v1125_v51  ;;  %v362_v51 = vrot.slane %v1508_v21, %v361_v49 }
  0x28   : > { %689 = vmatprep.subr.bf16.mxu1 %v1106_v52 }
  0x2a   : > { %1132 = vmatmul.mubr.msk.bf16.vlgmr.msra.gmra.mrb[4].mxu1 %vm556_vm0, %v1201_v36 }
  0x2b   : > { %690 = vmatpush1.bf16.msra.mxu1 %v1105_v55  ;;  %721 = vmatprep.mubr.bf16.mxu1 %v1282_v8  ;;  %v1208_v8 = vld [vmem:[%s1557_s4 + $0x58] sm:$0xff]  }
  0x2c   : > { %691 = vmatprep.subr.bf16.mxu1 %v1114_v56  ;;  %1160 = vmatprep.subr.bf16.mxu0 %v1208_v8 }
  0x2d   : > { %1161 = vmatpush3.bf16.msra.mxu0 %v1209_v9 }
  0x2e   : > { %1162 = vmatprep.subr.bf16.mxu0 %v1210_v10 }
  0x2f   : > { %692 = vmatpush1.bf16.msra.mxu1 %v1113_v59 }
  0x30   : > { %693 = vmatprep.subr.bf16.mxu1 %v1122_v60 }
  0x31   : > { %1163 = vmatpush3.bf16.msra.mxu0 %v1211_v11 }
  0x32   : > { %1164 = vmatprep.subr.bf16.mxu0 %v1212_v12 }
  0x33   : > { %694 = vmatpush1.bf16.msra.mxu1 %v1121_v63 }
  0x34   : > { %695 = vmatprep.subr.bf16.mxu1 %v1130_v0 }
  0x35   : > { %1165 = vmatpush3.bf16.msra.mxu0 %v1213_v13 }
  0x36   : > { %1166 = vmatprep.subr.bf16.mxu0 %v1214_v14 }
  0x37   : > { %696 = vmatpush1.bf16.msra.mxu1 %v1129_v1 }
  0x39   : > { %1167 = vmatpush3.bf16.msra.mxu0 %v1215_v15 }
  0x3a   : > { %1134 = vmatmul.mubr.msk.bf16.vlgmr.msra.gmra.mrb[8].mxu1 %vm556_vm0, %v1201_v36  ;;  %1168 = vmatprep.subr.bf16.mxu0 %v1216_v16 }
  0x3d   : > { %1169 = vmatpush3.bf16.msra.mxu0 %v1217_v17 }
  0xed   : > { %v594_v28 = vpop.f32.mrb[0].mxu1  ;;  %v680_v31 = vpop.f32.mrb[0].mxu0 }
  0xee   : > { %v595_v29 = vadd.f32 %v594_v28, %v354_v24  ;;  %v596_v30 = vpop.f32.mrb[1].mxu1  ;;  %v681_v35 = vadd.f32 %v680_v31, %v370_v27  ;;  %v682_v36 = vpop.f32.mrb[1].mxu0  ;;  %v378_v28 = vrot.slane %v1508_v21, %v377_v25 }
  0xef   : > { %v597_v33 = vadd.f32 %v596_v30, %v358_v26  ;;  %v598_v34 = vpop.f32.mrb[2].mxu1  ;;  %v684_v40 = vpop.f32.mrb[2].mxu0  ;;  %v683_v45 = vadd.f32 %v682_v36, %v374_v32 }
  0xf0   : > { %v732_v37 = vmul.f32 0.5, %v595_v29  ;;  %v599_v38 = vadd.f32 %v598_v34, %v354_v24  ;;  %v600_v39 = vpop.f32.mrb[3].mxu1  ;;  %1218 = vtanh.f32 %v681_v35  ;;  %v686_v43 = vpop.f32.mrb[3].mxu0  ;;  %v685_v47 = vadd.f32 %v684_v40, %v370_v27  ;;  %v315_v27 = vld [vmem:[%s304_s14] sm:$0x3] }
  0xf1   : > { %v733_v41 = vmul.f32 0.5, %v597_v33  ;;  %v601_v42 = vadd.f32 %v600_v39, %v358_v26  ;;  %v687_v48 = vadd.f32 %v686_v43, %v374_v32  ;;  %v381_v26 = vsub.s32 7, %v1502_v19 }
  0xf2   : > { %1220 = vtanh.f32 %v732_v37  ;;  %v734_v44 = vmul.f32 0.5, %v599_v38  ;;  %v788_v32 = vrot.slane %v315_v27, %v353_v20  ;;  %v792_v36 = vrot.slane %v315_v27, %v357_v22 }
  0xf3   : > { %1222 = vtanh.f32 %v733_v41  ;;  %v735_v46 = vmul.f32 0.5, %v601_v42  ;;  %v382_v29 = vrot.slane %v1508_v21, %v381_v26 }
  0xf4   : > { %1224 = vtanh.f32 %v734_v44 }
  0xf5   : > { %1226 = vtanh.f32 %v735_v46 }
  0xf6   : > { %1228 = vtanh.f32 %v683_v45 }
  0xf7   : > { %1230 = vtanh.f32 %v685_v47 }
  0xf8   : > { %1232 = vtanh.f32 %v687_v48 }
  0xfa   : > { %v1219_v52 = vpop.eup %1218 }
  0xfc   : > { %v1221_v54 = vpop.eup %1220 }
  0xfd   : > { %v1223_v55 = vpop.eup %1222  ;;  %v740_v56 = vmul.f32 0.5, %v1221_v54  ;;  %v637_v57 = vpop.f32.mrb[4].mxu1 }
  0xfe   : > { %v1225_v58 = vpop.eup %1224  ;;  %v741_v59 = vmul.f32 0.5, %v1223_v55  ;;  %v638_v60 = vadd.f32 %v637_v57, %v362_v51  ;;  %v639_v61 = vpop.f32.mrb[5].mxu1 }
  0xff   : > { %v1227_v62 = vpop.eup %1226  ;;  %v744_v63 = vadd.f32 0.5, %v740_v56  ;;  %v742_v0 = vmul.f32 0.5, %v1225_v58  ;;  %v640_v1 = vadd.f32 %v639_v61, %v366_v53  ;;  %v641_v2 = vpop.f32.mrb[6].mxu1 }
 0x100   : > { %v1229_v3 = vpop.eup %1228  ;;  %v745_v4 = vadd.f32 0.5, %v741_v59  ;;  %v743_v5 = vmul.f32 0.5, %v1227_v62  ;;  %v748_v6 = vmul.f32 0.5, %v638_v60  ;;  %v642_v7 = vadd.f32 %v641_v2, %v362_v51  ;;  %v643_v8 = vpop.f32.mrb[7].mxu1 }
 0x101   : > { %v1231_v9 = vpop.eup %1230  ;;  %v746_v10 = vadd.f32 0.5, %v742_v0  ;;  %v799_v11 = vmul.f32 %v1219_v52, %v744_v63  ;;  %v749_v12 = vmul.f32 0.5, %v640_v1  ;;  %v644_v13 = vadd.f32 %v643_v8, %v366_v53 }
 0x102   : > { %v1233_v14 = vpop.eup %1232  ;;  %v747_v15 = vadd.f32 0.5, %v743_v5  ;;  %1234 = vtanh.f32 %v748_v6  ;;  %v800_v16 = vmul.f32 %v1229_v3, %v745_v4  ;;  %v750_v17 = vmul.f32 0.5, %v642_v7 }
 0x103   : > { %1236 = vtanh.f32 %v749_v12  ;;  %v801_v18 = vmul.f32 %v1231_v9, %v746_v10  ;;  %v751_v23 = vmul.f32 0.5, %v644_v13 }
 0x104   : > { %1238 = vtanh.f32 %v750_v17  ;;  %v802_v24 = vmul.f32 %v1233_v14, %v747_v15 }
 0x105   : > { %1240 = vtanh.f32 %v751_v23  ;;  %v1135_v23 = vld [vmem:[%s1558_s5] ss:$0 sm:$0xff] }
 0x10c   : > { %v1235_v30 = vpop.eup %1234 }
 0x10d   : > { %v1237_v31 = vpop.eup %1236  ;;  %v756_v33 = vmul.f32 0.5, %v1235_v30  ;;  %v723_v34 = vpop.f32.mrb[8].mxu1 }
 0x10e   : > { %v1239_v35 = vpop.eup %1238  ;;  %v757_v37 = vmul.f32 0.5, %v1237_v31  ;;  %v724_v38 = vadd.f32 %v723_v34, %v378_v28  ;;  %v725_v39 = vpop.f32.mrb[9].mxu1 }
 0x10f   : > { %v1241_v40 = vpop.eup %1240  ;;  %v760_v41 = vadd.f32 0.5, %v756_v33  ;;  %v758_v42 = vmul.f32 0.5, %v1239_v35  ;;  %v726_v43 = vadd.f32 %v725_v39, %v382_v29  ;;  %v727_v44 = vpop.f32.mrb[10].mxu1 }
 0x110   : > { %v761_v21 = vadd.f32 0.5, %v757_v37  ;;  %v759_v45 = vmul.f32 0.5, %v1241_v40  ;;  %v768_v46 = vmul.f32 0.5, %v724_v38  ;;  %v728_v47 = vadd.f32 %v727_v44, %v378_v28  ;;  %v729_v48 = vpop.f32.mrb[11].mxu1 }
 0x111   : > { %v795_v20 = vmul.f32 %v788_v32, %v760_v41  ;;  %v762_v49 = vadd.f32 0.5, %v758_v42  ;;  %v769_v50 = vmul.f32 0.5, %v726_v43  ;;  %v730_v51 = vadd.f32 %v729_v48, %v382_v29 }
 0x112   : > { %v796_v52 = vmul.f32 %v792_v36, %v761_v21  ;;  %v763_v19 = vadd.f32 0.5, %v759_v45  ;;  %1242 = vtanh.f32 %v768_v46  ;;  %v770_v22 = vmul.f32 0.5, %v728_v47 }
 0x113   : > { %v803_v53 = vadd.f32 %v799_v11, %v795_v20  ;;  %v797_v54 = vmul.f32 %v788_v32, %v762_v49  ;;  %1244 = vtanh.f32 %v769_v50  ;;  %v771_v58 = vmul.f32 0.5, %v730_v51 }
 0x114   : > { %v804_v55 = vadd.f32 %v800_v16, %v796_v52  ;;  %v798_v56 = vmul.f32 %v792_v36, %v763_v19  ;;  %1246 = vtanh.f32 %v770_v22 }
 0x115   : > { %1248 = vtanh.f32 %v803_v53  ;;  %v805_v57 = vadd.f32 %v801_v18, %v797_v54 }
 0x116   : > { %1250 = vtanh.f32 %v804_v55  ;;  %v806_v59 = vadd.f32 %v802_v24, %v798_v56 }
 0x117   : > { %1252 = vtanh.f32 %v805_v57 }
 0x118   : > { %1254 = vtanh.f32 %v771_v58 }
 0x119   : > { %1256 = vtanh.f32 %v806_v59 }
 0x11c   : > { %v1243_v60 = vpop.eup %1242 }
 0x11d   : > { %v1245_v61 = vpop.eup %1244  ;;  %v776_v62 = vmul.f32 0.5, %v1243_v60 }
 0x11e   : > { %v1247_v63 = vpop.eup %1246  ;;  %v777_v0 = vmul.f32 0.5, %v1245_v61 }
 0x11f   : > { %v1249_v1 = vpop.eup %1248  ;;  %v780_v2 = vadd.f32 0.5, %v776_v62  ;;  %v778_v3 = vmul.f32 0.5, %v1247_v63 }
 0x120   : > { %v1251_v4 = vpop.eup %1250  ;;  %v781_v5 = vadd.f32 0.5, %v777_v0 }
 0x121   : > { %v1253_v6 = vpop.eup %1252  ;;  %v811_v7 = vmul.f32 %v1249_v1, %v780_v2  ;;  %v782_v8 = vadd.f32 0.5, %v778_v3 }
 0x122   : > { %v812_v9 = vmul.f32 %v1251_v4, %v781_v5  ;;  %v1255_v10 = vpop.eup %1254 }
 0x123   : > { %v813_v11 = vmul.f32 %v1253_v6, %v782_v8  ;;  %v779_v12 = vmul.f32 0.5, %v1255_v10  ;;  %v1257_v13 = vpop.eup %1256 }
 0x125   : > { %v815_v14 = vpack.c.bf16 %v813_v11, %v811_v7  ;;  %v783_v15 = vadd.f32 0.5, %v779_v12 }
 0x127   : > { %v814_v16 = vmul.f32 %v1257_v13, %v783_v15 }
 0x129   : > { %v816_v17 = vpack.c.bf16 %v814_v16, %v812_v9 }
 0x12b   : > { %984 = vmatprep.mubr.bf16.mxu0 %v816_v17 }
 0x12c   : > { %985 = vmatmul.mubr.bf16.vlgmr.msra.gmra.mrb[4].mxu0 %v815_v14 }
 0x1ff   : > { %v1170_v18 = vpop.f32.mrb[4].mxu0 }
 0x200   : > { %v1171_v24 = vpop.f32.mrb[5].mxu0 }
 0x201   : > { %v1172_v25 = vadd.f32 %v1171_v24, %v1170_v18  ;;  %v1173_v26 = vpop.f32.mrb[6].mxu0 }
 0x202   : > { %v1174_v27 = vpop.f32.mrb[7].mxu0 }
 0x203   : > { %v987_v28 = vadd.f32 %v1172_v25, %v1135_v23  ;;  %v1175_v29 = vadd.f32 %v1174_v27, %v1173_v26 }
 0x205   : > { %993 = vst [vmem:[%s310_s19] sm:$0xff] %v987_v28  ;;  %v990_v30 = vadd.f32 %v1175_v29, %v1135_v23 }
 0x207   : > { %994 = vst [vmem:[%s310_s19 + $0x8] sm:$0xff] %v990_v30 }
 0x208 PF: > { %s16_s23 = sadd.s32 1, %s1280_s23   ;;  %s1560_s21 = smov %s1276_s22 }
 0x209   : > { %p13_p6 = scmp.ge.s32.totalorder %s16_s23, 4   ;;  %s1561_s22 = smov %s1563_s24 }
 0x20b   :  { %15 = sbr.rel (!%p13_p6) target bundleno = 2 (0x2), region = 80 }

</bundles_post_ra>
